<compile_context>
chip_gen: v7x
topology: tpu7x:2x2x1
jax: 0.10.0
libtpu: 0.0.40
codegen_flags: <defaults>
</compile_context>

<pallas_src>
import functools

import jax
import jax.numpy as jnp
from jax import lax
from jax.experimental import pallas as pl
from jax.experimental.pallas import tpu as pltpu

LANE = 128
SUBLANE = 8


def _masked_l1_kernel(x_ref, t_ref, m_ref, o_ref, *, tm, rows_valid,
                      steps_per_split, needs_mask):
    c = pl.program_id(0)   # parallel split (own TensorCore on multi-TC chips)
    i = pl.program_id(1)   # reduction step within the split

    @pl.when(i == 0)
    def _():
        o_ref[...] = jnp.zeros_like(o_ref)

    x = x_ref[...].astype(jnp.float32)
    t = t_ref[...].astype(jnp.float32)
    m = m_ref[...].astype(jnp.float32)
    diff = jnp.abs((x - t) * m)          # == |x*m - t*m|

    def fold(d):
        # Fold the (tm, 128) tile onto one (8,128) vreg with pure VALU adds.
        return d.reshape(tm // SUBLANE, SUBLANE, LANE).sum(axis=0)

    if not needs_mask:
        # Grid exactly tiles the rows: hot path, no masking anywhere.
        o_ref[...] += fold(diff)
    else:
        # Logical row offset of this step (NOT the clamped block index).
        row_start = (c * steps_per_split + i) * tm
        clean = row_start + tm <= rows_valid

        @pl.when(clean)
        def _():                                  # hot path: plain accumulate
            o_ref[...] += fold(diff)

        @pl.when(jnp.logical_not(clean))
        def _():                                  # cold path: edge / duplicate block
            row_idx = lax.broadcasted_iota(jnp.int32, (tm, LANE), 0) + row_start
            o_ref[...] += fold(jnp.where(row_idx < rows_valid, diff, 0.0))


def _row_granule(*dtypes):
    """Smallest legal sublane multiple given the packing of all input dtypes."""
    g = SUBLANE
    for dt in dtypes:
        g = max(g, 32 // max(1, jnp.dtype(dt).itemsize))
    return g


def _default_num_splits():
    """TensorCores per JAX device: 2 on v7x / v4 / v5p style devices, else 1."""
    try:
        kind = jax.devices()[0].device_kind.lower()
    except Exception:
        return 1
    for tag in ("v7", "v4", "v5p"):
        if tag in kind:
            return 2
    return 1


def _l1_sum_f32(x, t, m):
    return jnp.sum(jnp.abs((x.astype(jnp.float32) - t.astype(jnp.float32))
                           * m.astype(jnp.float32)))


@functools.partial(jax.jit, static_argnames=("block_rows", "num_splits"))
def masked_l1_loss(inp, target, mask, block_rows=4096, num_splits=None):
    """mean(|inp*mask - target*mask|) over all elements (any matching shapes)."""
    assert inp.shape == target.shape == mask.shape
    n_elems = inp.size

    xf, tf, mf = inp.reshape(-1), target.reshape(-1), mask.reshape(-1)
    granule = _row_granule(inp.dtype, target.dtype, mask.dtype)

    n_main = (n_elems // LANE) * LANE
    rows = n_main // LANE

    if rows < granule:
        # Tiny input: not worth a kernel launch (also avoids blocks larger than
        # the array).
        total = _l1_sum_f32(xf, tf, mf)
        return (total / jnp.float32(n_elems)).astype(inp.dtype)

    tail_sum = jnp.float32(0.0)
    if n_main != n_elems:
        # Lane-unaligned tail (<128 elems): tiny wrapper-side reduce. Only this
        # rare case pays one HBM pass for the prefix slice; lane-aligned inputs
        # (the common case) are a zero-copy reshape.
        tail_sum = _l1_sum_f32(xf[n_main:], tf[n_main:], mf[n_main:])
        xf, tf, mf = xf[:n_main], tf[:n_main], mf[:n_main]

    x2 = xf.reshape(rows, LANE)                   # lane-dense slab, native dtype
    t2 = tf.reshape(rows, LANE)
    m2 = mf.reshape(rows, LANE)

    # ---- tiling / split selection -------------------------------------------
    splits_req = _default_num_splits() if num_splits is None else int(num_splits)

    sum_itemsize = sum(jnp.dtype(a.dtype).itemsize for a in (x2, t2, m2))
    per_row_bytes = 2 * LANE * sum_itemsize       # double-buffered input bytes/row
    tm_cap = max(granule, ((32 << 20) // per_row_bytes) // granule * granule)

    tm = min(block_rows, rows, tm_cap)
    tm = max(granule, (tm // granule) * granule)  # multiple of granule, <= rows

    total_steps = -(-rows // tm)                  # cdiv
    splits = splits_req if (splits_req > 1 and total_steps >= splits_req) else 1
    steps_per_split = -(-total_steps // splits)
    last_block = total_steps - 1
    needs_mask = (splits * steps_per_split * tm) != rows

    if splits * steps_per_split == total_steps:
        def in_map(c, i):
            return (c * steps_per_split + i, 0)
    else:
        def in_map(c, i):
            # Clamp so ragged splits never request a fully out-of-bounds block;
            # the duplicate block's contribution is zeroed by the cold-path mask.
            return (jnp.minimum(c * steps_per_split + i, last_block), 0)

    in_tile_bytes = per_row_bytes * tm
    vmem_limit = int(min(max(in_tile_bytes + (8 << 20), 32 << 20), 48 << 20))

    cost = pl.CostEstimate(
        flops=4 * n_main,
        transcendentals=0,
        bytes_accessed=n_main * sum_itemsize + splits * SUBLANE * LANE * 4,
    )

    kernel = functools.partial(
        _masked_l1_kernel, tm=tm, rows_valid=rows,
        steps_per_split=steps_per_split, needs_mask=needs_mask)

    spec = pl.BlockSpec((tm, LANE), in_map)
    partial_sums = pl.pallas_call(
        kernel,
        out_shape=jax.ShapeDtypeStruct((splits * SUBLANE, LANE), jnp.float32),
        grid_spec=pltpu.PrefetchScalarGridSpec(
            num_scalar_prefetch=0,
            grid=(splits, steps_per_split),
            in_specs=[spec, spec, spec],
            out_specs=pl.BlockSpec((SUBLANE, LANE), lambda c, i: (c, 0)),
        ),
        compiler_params=pltpu.CompilerParams(
            dimension_semantics=("parallel", "arbitrary"),
            vmem_limit_bytes=vmem_limit,
        ),
        cost_estimate=cost,
    )(x2, t2, m2)

    total = jnp.sum(partial_sums) + tail_sum      # one tiny final reduce
    return (total / jnp.float32(n_elems)).astype(inp.dtype)


def _ref_loss(x, t, m):
    return jnp.mean(jnp.abs(x * m - t * m))


if __name__ == "__main__":
    key = jax.random.PRNGKey(0)
    ks = jax.random.split(key, 15)

    # Test 1: NCHW, lane-aligned size, default tile (zero-copy path).
    shape = (2, 4, 16, 16)
    x = jax.random.normal(ks[0], shape, dtype=jnp.float32)
    t = jax.random.normal(ks[1], shape, dtype=jnp.float32)
    m = (jax.random.uniform(ks[2], shape) > 0.5).astype(jnp.float32)
    loss = masked_l1_loss(x, t, m)
    jax.block_until_ready(loss)
    assert jnp.allclose(loss, _ref_loss(x, t, m), rtol=1e-5, atol=1e-6)

    # Test 2: ragged rows + forced 2-way split + small tiles -> exercises the
    # clamped index map, the cold masked branch, and the duplicate-block zeroing.
    shape2 = (2, 5, 16, 16)
    x2 = jax.random.normal(ks[3], shape2, dtype=jnp.float32)
    t2 = jax.random.normal(ks[4], shape2, dtype=jnp.float32)
    m2 = (jax.random.uniform(ks[5], shape2) > 0.5).astype(jnp.float32)
    loss2 = masked_l1_loss(x2, t2, m2, block_rows=8, num_splits=2)
    jax.block_until_ready(loss2)
    assert jnp.allclose(loss2, _ref_loss(x2, t2, m2), rtol=1e-5, atol=1e-6)

    # Test 3: boolean mask streamed in native dtype (no caller-side upcast).
    shape3 = (4, 8, 16, 16)
    x3 = jax.random.normal(ks[6], shape3, dtype=jnp.float32)
    t3 = jax.random.normal(ks[7], shape3, dtype=jnp.float32)
    m3 = jax.random.uniform(ks[8], shape3) > 0.5          # bool
    loss3 = masked_l1_loss(x3, t3, m3)
    jax.block_until_ready(loss3)
    assert jnp.allclose(loss3, _ref_loss(x3, t3, m3.astype(jnp.float32)),
                        rtol=1e-5, atol=1e-6)

    # Test 4: lane-unaligned element count -> wrapper-side tail reduce.
    shape4 = (2, 5, 110)
    x4 = jax.random.normal(ks[9], shape4, dtype=jnp.float32)
    t4 = jax.random.normal(ks[10], shape4, dtype=jnp.float32)
    m4 = (jax.random.uniform(ks[11], shape4) > 0.5).astype(jnp.float32)
    loss4 = masked_l1_loss(x4, t4, m4)
    jax.block_until_ready(loss4)
    assert jnp.allclose(loss4, _ref_loss(x4, t4, m4), rtol=1e-5, atol=1e-6)

    # Test 5: tiny input -> pure-wrapper fallback path.
    shape5 = (3, 7)
    x5 = jax.random.normal(ks[12], shape5, dtype=jnp.float32)
    t5 = jax.random.normal(ks[13], shape5, dtype=jnp.float32)
    m5 = (jax.random.uniform(ks[14], shape5) > 0.5).astype(jnp.float32)
    loss5 = masked_l1_loss(x5, t5, m5)
    jax.block_until_ready(loss5)
    assert jnp.allclose(loss5, _ref_loss(x5, t5, m5), rtol=1e-5, atol=1e-6)

    print("KERNEL_OK")
</pallas_src>

<mosaic_0001>
module attributes {stable_mosaic.version = 11 : i64} {
  func.func @_masked_l1_kernel(%arg0: i32, %arg1: i32, %arg2: memref<16x128xf32, #tpu.memory_space<vmem>>, %arg3: memref<16x128xf32, #tpu.memory_space<vmem>>, %arg4: memref<16x128xf32, #tpu.memory_space<vmem>>, %arg5: memref<8x128xf32, #tpu.memory_space<vmem>>) attributes {dimension_semantics = [#tpu.dimension_semantics<parallel>, #tpu.dimension_semantics<arbitrary>], iteration_bounds = array<i64: 1, 1>, scalar_prefetch = 0 : i64, scratch_operands = 0 : i64, tpu.core_type = #tpu.core_type<tc>, window_params = [{transform_indices = @transform_0, window_bounds = array<i64: 16, 128>}, {transform_indices = @transform_1, window_bounds = array<i64: 16, 128>}, {transform_indices = @transform_2, window_bounds = array<i64: 16, 128>}, {transform_indices = @transform_3, window_bounds = array<i64: 8, 128>}]} {
    %c0_i32 = arith.constant 0 : i32
    %0 = arith.cmpi eq, %arg1, %c0_i32 : i32
    %1 = arith.extui %0 : i1 to i32
    %c0_i32_0 = arith.constant 0 : i32
    %2 = arith.cmpi ne, %1, %c0_i32_0 : i32
    scf.if %2 {
      %cst_10 = arith.constant 0.000000e+00 : f32
      %14 = vector.broadcast %cst_10 : f32 to vector<8x128xf32>
      %c0_11 = arith.constant 0 : index
      %c0_12 = arith.constant 0 : index
      %15 = vector.load %arg5[%c0_11, %c0_12] : memref<8x128xf32, #tpu.memory_space<vmem>>, vector<8x128xf32>
      tpu.vector_store %arg5[%c0_11, %c0_12], %14 {strides = array<i32>} : memref<8x128xf32, #tpu.memory_space<vmem>>, vector<8x128xf32>,
    } else {
    }
    %c0 = arith.constant 0 : index
    %c0_1 = arith.constant 0 : index
    %3 = vector.load %arg2[%c0, %c0_1] : memref<16x128xf32, #tpu.memory_space<vmem>>, vector<16x128xf32>
    %c0_2 = arith.constant 0 : index
    %c0_3 = arith.constant 0 : index
    %4 = vector.load %arg3[%c0_2, %c0_3] : memref<16x128xf32, #tpu.memory_space<vmem>>, vector<16x128xf32>
    %c0_4 = arith.constant 0 : index
    %c0_5 = arith.constant 0 : index
    %5 = vector.load %arg4[%c0_4, %c0_5] : memref<16x128xf32, #tpu.memory_space<vmem>>, vector<16x128xf32>
    %6 = arith.subf %3, %4 : vector<16x128xf32>
    %7 = arith.mulf %6, %5 : vector<16x128xf32>
    %8 = math.absf %7 : vector<16x128xf32>
    %c0_6 = arith.constant 0 : index
    %c0_7 = arith.constant 0 : index
    %9 = vector.load %arg5[%c0_6, %c0_7] : memref<8x128xf32, #tpu.memory_space<vmem>>, vector<8x128xf32>
    %10 = vector.shape_cast %8 : vector<16x128xf32> to vector<2x8x128xf32>
    %cst = arith.constant dense<0.000000e+00> : vector<8x128xf32>
    %11 = vector.multi_reduction <add>, %10, %cst [0] : vector<2x8x128xf32> to vector<8x128xf32>
    %12 = arith.addf %9, %11 : vector<8x128xf32>
    %c0_8 = arith.constant 0 : index
    %c0_9 = arith.constant 0 : index
    %13 = vector.load %arg5[%c0_8, %c0_9] : memref<8x128xf32, #tpu.memory_space<vmem>>, vector<8x128xf32>
    tpu.vector_store %arg5[%c0_8, %c0_9], %12 {strides = array<i32>} : memref<8x128xf32, #tpu.memory_space<vmem>>, vector<8x128xf32>,
    return
  }
  func.func @transform_0(%arg0: i32, %arg1: i32) -> (i32, i32) {
    %c1_i32 = arith.constant 1 : i32
    %0 = arith.muli %arg0, %c1_i32 : i32
    %1 = arith.addi %0, %arg1 : i32
    %c0_i32 = arith.constant 0 : i32
    %c0_i32_0 = arith.constant 0 : i32
    return %1, %c0_i32 : i32, i32
  }
  func.func @transform_1(%arg0: i32, %arg1: i32) -> (i32, i32) {
    %c1_i32 = arith.constant 1 : i32
    %0 = arith.muli %arg0, %c1_i32 : i32
    %1 = arith.addi %0, %arg1 : i32
    %c0_i32 = arith.constant 0 : i32
    %c0_i32_0 = arith.constant 0 : i32
    return %1, %c0_i32 : i32, i32
  }
  func.func @transform_2(%arg0: i32, %arg1: i32) -> (i32, i32) {
    %c1_i32 = arith.constant 1 : i32
    %0 = arith.muli %arg0, %c1_i32 : i32
    %1 = arith.addi %0, %arg1 : i32
    %c0_i32 = arith.constant 0 : i32
    %c0_i32_0 = arith.constant 0 : i32
    return %1, %c0_i32 : i32, i32
  }
  func.func @transform_3(%arg0: i32, %arg1: i32) -> (i32, i32) {
    %c0_i32 = arith.constant 0 : i32
    %c0_i32_0 = arith.constant 0 : i32
    return %arg0, %c0_i32 : i32, i32
  }
}

</mosaic_0001>

<bundles_post_ra>
// kernel: masked_l1_loss.1
= control target key start
LH: loop header
LB: loop body
LE: loop exit
PB: predicated region body
PF: predicated region fallthrough
CT: control target
= control target key end

     0   :  { %s165_s0 = inlined_call_operand.vmem [shape: f32[16,128], index: 0, kind: input, shape index: {}]   ;;  %s166_s1 = inlined_call_operand.vmem [shape: f32[16,128], index: 1, kind: input, shape index: {}]   ;;  %s167_s2 = inlined_call_operand.vmem [shape: f32[16,128], index: 2, kind: input, shape index: {}]   ;;  %s168_s3 = inlined_call_operand.vmem [shape: f32[8,128], index: 3, kind: output, shape index: {}]  }
   0x1   :  { %v85_v0 = vld [vmem:[%s165_s0] sm:$0xff]  ;;  %v86_v1 = vld [vmem:[%s165_s0 + $0x8] sm:$0xff] }
   0x2   :  { %v87_v2 = vld [vmem:[%s166_s1] sm:$0xff]  ;;  %v88_v3 = vld [vmem:[%s166_s1 + $0x8] sm:$0xff] }
   0x3   :  { %v89_v4 = vld [vmem:[%s167_s2] sm:$0xff]  ;;  %v90_v5 = vld [vmem:[%s167_s2 + $0x8] sm:$0xff]  ;;  %v91_v6 = vsub.f32 %v85_v0, %v87_v2  ;;  %v92_v7 = vsub.f32 %v86_v1, %v88_v3 }
   0x5   :  { %v93_v8 = vmul.f32 %v91_v6, %v89_v4  ;;  %v94_v9 = vmul.f32 %v92_v7, %v90_v5 }
   0x7   :  { %v95_v10 = vand.u32 2147483647, %v93_v8  ;;  %v96_v11 = vand.u32 2147483647, %v94_v9 }
   0x9   :  { %v98_v12 = vadd.f32 %v96_v11, %v95_v10 }
   0xb   :  { %100 = vst [vmem:[%s168_s3] sm:$0xff] %v98_v12 }

</bundles_post_ra>
